<compile_context>
chip_gen: v5e
topology: v5e:2x2
jax: 0.10.0
libtpu: 0.0.40
codegen_flags: <defaults>
</compile_context>

<pallas_src>
import functools

import jax
import jax.numpy as jnp
from jax.experimental import pallas as pl
from jax.experimental.pallas import tpu as pltpu  # noqa: F401  (TPU backend / memory spaces)

LEAKY_SLOPE = 0.01   # nn.LeakyReLU default
DROPOUT_P = 0.2      # nn.Dropout(0.2) (training-mode semantics; keep-mask supplied from host)


def _ru(n, m=128):
    """Round n up to a multiple of m (lane-tile alignment for packed blobs)."""
    return (n + m - 1) // m * m


def _leaky_relu(x):
    return jnp.where(x > 0, x, LEAKY_SLOPE * x)


def vae_kernel(acts_ref, w_in_ref, w_out_ref, b_ref, recon_ref, mulv_ref, *, d, l, h):
    """Fused VAE forward (single gridless invocation, everything resident in VMEM).

    acts_ref : (B, ru(d)+ru(l)+h) f32   [ x | pad | eps | pad | drop_keep_mask ]
    w_in_ref : (d+l, h)           bf16  rows [0:d] = W1,  rows [d:d+l] = W3
    w_out_ref: (h, ru(2l)+ru(d))  bf16  cols [0:2l] = [W21|W22], cols [ru(2l):+d] = W4
    b_ref    : (1, ru(h)+ru(2l)+ru(h)+ru(d)) f32  [ b1 | b21|b22 | b3 | b4 ] (aligned segments)
    recon_ref: (B, d)  f32
    mulv_ref : (B, 2l) f32  ([:, :l] = mu, [:, l:] = logvar)
    """
    off_eps = _ru(d)
    off_mask = off_eps + _ru(l)
    off_b2 = _ru(h)
    off_b3 = off_b2 + _ru(2 * l)
    off_b4 = off_b3 + _ru(h)
    off_w4 = _ru(2 * l)

    x = acts_ref[:, 0:d]
    eps = acts_ref[:, off_eps:off_eps + l]
    keep = acts_ref[:, off_mask:off_mask + h]

    w1 = w_in_ref[0:d, :]
    w3 = w_in_ref[d:d + l, :]
    w2 = w_out_ref[:, 0:2 * l]
    w4 = w_out_ref[:, off_w4:off_w4 + d]

    b1 = b_ref[:, 0:h]
    b2 = b_ref[:, off_b2:off_b2 + 2 * l]
    b3 = b_ref[:, off_b3:off_b3 + h]
    b4 = b_ref[:, off_b4:off_b4 + d]

    bf16 = jnp.bfloat16

    # ---- encode: fc1 = Linear + LeakyReLU + Dropout(0.2) ----
    h1 = jnp.dot(x.astype(bf16), w1, preferred_element_type=jnp.float32) + b1
    h1 = _leaky_relu(h1)
    h1 = h1 * keep * (1.0 / (1.0 - DROPOUT_P))

    # ---- fused mu/logvar head: one (B, 2L) matmul instead of two (B, L) matmuls ----
    mulv = jnp.dot(h1.astype(bf16), w2, preferred_element_type=jnp.float32) + b2
    mu = mulv[:, :l]
    logvar = mulv[:, l:]

    # ---- reparameterize: z = mu + eps * exp(0.5 * logvar) ----
    z = mu + eps * jnp.exp(0.5 * logvar)

    # ---- decode: fc3 = Linear + LeakyReLU ; fc4 = Linear + Sigmoid ----
    h3 = jnp.dot(z.astype(bf16), w3, preferred_element_type=jnp.float32) + b3
    h3 = _leaky_relu(h3)
    logits = jnp.dot(h3.astype(bf16), w4, preferred_element_type=jnp.float32) + b4
    recon = jax.nn.sigmoid(logits)

    recon_ref[...] = recon.astype(recon_ref.dtype)
    mulv_ref[...] = mulv.astype(mulv_ref.dtype)


def pack_params(params, input_dim, latent_dim, hidden=512):
    """Pack the 10 linear params into 3 blobs (2x bf16 weight blobs + 1x f32 bias blob)."""
    d, l, h = input_dim, latent_dim, hidden
    # bf16 sublane tile is 16 rows: keep in-kernel row slices tile-aligned.
    assert d % 16 == 0 and l % 16 == 0 and h % 128 == 0, "pack_params alignment requirement"
    bf16 = jnp.bfloat16

    # blob 1: W1 (d, h) stacked over W3 (l, h)  -> (d+l, h)
    w_in = jnp.concatenate([params["w1"], params["w3"]], axis=0).astype(bf16)

    # blob 2: [W21|W22] (h, 2l) at col 0, W4 (h, d) at col ru(2l)
    w2c = jnp.concatenate([params["w21"], params["w22"]], axis=1)
    w_out = jnp.zeros((h, _ru(2 * l) + _ru(d)), jnp.float32)
    w_out = w_out.at[:, 0:2 * l].set(w2c)
    w_out = w_out.at[:, _ru(2 * l):_ru(2 * l) + d].set(params["w4"])
    w_out = w_out.astype(bf16)

    # blob 3: biases, f32, each segment starting at a multiple of 128 lanes
    off_b2 = _ru(h)
    off_b3 = off_b2 + _ru(2 * l)
    off_b4 = off_b3 + _ru(h)
    biases = jnp.zeros((1, off_b4 + _ru(d)), jnp.float32)
    biases = biases.at[:, 0:h].set(params["b1"])
    biases = biases.at[:, off_b2:off_b2 + 2 * l].set(
        jnp.concatenate([params["b21"], params["b22"]], axis=1))
    biases = biases.at[:, off_b3:off_b3 + h].set(params["b3"])
    biases = biases.at[:, off_b4:off_b4 + d].set(params["b4"])
    return w_in, w_out, biases


@jax.jit
def vae_forward(x, eps, drop_mask, w_in, w_out, biases):
    B, d = x.shape
    l = eps.shape[1]
    h = drop_mask.shape[1]

    # Pack per-call activations into one blob: [ x | pad | eps | pad | drop_mask ],
    # segments lane-aligned, so the kernel sees a single input DMA for all of them.
    acts = jnp.concatenate(
        [x, jnp.zeros((B, _ru(d) - d), jnp.float32),
         eps, jnp.zeros((B, _ru(l) - l), jnp.float32),
         drop_mask], axis=1)

    kernel = functools.partial(vae_kernel, d=d, l=l, h=h)
    # Tiny problem (everything < 1 MiB): single gridless call, full-array (default)
    # BlockSpecs, all operands resident in VMEM.
    # TODO(synk): for large B, add a 1-D "parallel" batch grid (block 128/256 rows) with a
    # constant index_map for the weight blobs so both v7x TensorCores are engaged.
    recon, mulv = pl.pallas_call(
        kernel,
        out_shape=(jax.ShapeDtypeStruct((B, d), jnp.float32),
                   jax.ShapeDtypeStruct((B, 2 * l), jnp.float32)),
    )(acts, w_in, w_out, biases)
    return recon, mulv[:, :l], mulv[:, l:]


def init_params(key, input_dim, latent_dim, hidden=512):
    """Deterministic synthetic init. Weights stored as [in, out] (transposed vs PyTorch)."""
    ks = jax.random.split(key, 10)

    def lin(kw, kb, fan_in, fan_out):
        # PyTorch nn.Linear default: U(-1/sqrt(fan_in), 1/sqrt(fan_in))
        bound = 1.0 / jnp.sqrt(fan_in)
        w = jax.random.uniform(kw, (fan_in, fan_out), jnp.float32, -bound, bound)
        b = jax.random.uniform(kb, (1, fan_out), jnp.float32, -bound, bound)
        return w, b

    w1, b1 = lin(ks[0], ks[1], input_dim, hidden)
    w21, b21 = lin(ks[2], ks[3], hidden, latent_dim)
    w22, b22 = lin(ks[4], ks[5], hidden, latent_dim)
    w3, b3 = lin(ks[6], ks[7], latent_dim, hidden)
    w4, b4 = lin(ks[8], ks[9], hidden, input_dim)
    return dict(w1=w1, b1=b1, w21=w21, b21=b21, w22=w22, b22=b22,
                w3=w3, b3=b3, w4=w4, b4=b4)


def reference_forward(x, params, eps, drop_mask):
    """Pure-JAX reference with the same bf16-matmul / f32-accumulate mixed precision."""
    bf16 = jnp.bfloat16

    def mm(a, w):
        return jnp.dot(a.astype(bf16), w.astype(bf16), preferred_element_type=jnp.float32)

    h1 = _leaky_relu(mm(x, params["w1"]) + params["b1"])
    h1 = h1 * drop_mask / (1.0 - DROPOUT_P)
    mu = mm(h1, params["w21"]) + params["b21"]
    logvar = mm(h1, params["w22"]) + params["b22"]
    z = mu + eps * jnp.exp(0.5 * logvar)
    h3 = _leaky_relu(mm(z, params["w3"]) + params["b3"])
    recon = jax.nn.sigmoid(mm(h3, params["w4"]) + params["b4"])
    return recon, mu, logvar


if __name__ == "__main__":
    # Small shapes consistent with the module: flattened input vectors.
    B, INPUT_DIM, LATENT_DIM, HIDDEN = 8, 64, 16, 512

    key = jax.random.PRNGKey(0)
    k_x, k_p, k_eps, k_drop = jax.random.split(key, 4)

    x = jax.nn.sigmoid(jax.random.normal(k_x, (B, INPUT_DIM), jnp.float32))  # values in (0,1)
    params = init_params(k_p, INPUT_DIM, LATENT_DIM, HIDDEN)
    eps = jax.random.normal(k_eps, (B, LATENT_DIM), jnp.float32)             # torch.randn_like(std)
    # Training-mode dropout keep-mask (Bernoulli(1-p)); pass ones for eval mode.
    drop_mask = jax.random.bernoulli(k_drop, 1.0 - DROPOUT_P, (B, HIDDEN)).astype(jnp.float32)

    w_in, w_out, biases = pack_params(params, INPUT_DIM, LATENT_DIM, HIDDEN)

    recon, mu, logvar = vae_forward(x, eps, drop_mask, w_in, w_out, biases)
    jax.block_until_ready((recon, mu, logvar))

    # Correctness check against mixed-precision pure-JAX reference.
    r_ref, mu_ref, lv_ref = reference_forward(x, params, eps, drop_mask)
    assert jnp.allclose(recon, r_ref, atol=2e-2, rtol=2e-2)
    assert jnp.allclose(mu, mu_ref, atol=2e-2, rtol=2e-2)
    assert jnp.allclose(logvar, lv_ref, atol=2e-2, rtol=2e-2)
    assert recon.shape == (B, INPUT_DIM) and mu.shape == (B, LATENT_DIM) and logvar.shape == (B, LATENT_DIM)

    # TODO(synk): loss_function (BCE + beta*KL) is a training-time reduction and not part of forward().
    print("KERNEL_OK")
</pallas_src>

<mosaic_0001>
module attributes {stable_mosaic.version = 11 : i64} {
  func.func @vae_kernel(%arg0: memref<8x768xf32, #tpu.memory_space<vmem>>, %arg1: memref<80x512xbf16, #tpu.memory_space<vmem>>, %arg2: memref<512x256xbf16, #tpu.memory_space<vmem>>, %arg3: memref<1x1280xf32, #tpu.memory_space<vmem>>, %arg4: memref<8x64xf32, #tpu.memory_space<vmem>>, %arg5: memref<8x32xf32, #tpu.memory_space<vmem>>) attributes {dimension_semantics = [], scalar_prefetch = 0 : i64, scratch_operands = 0 : i64, tpu.core_type = #tpu.core_type<tc>} {
    %c0 = arith.constant 0 : index
    %c0_0 = arith.constant 0 : index
    %0 = vector.load %arg0[%c0, %c0_0] : memref<8x768xf32, #tpu.memory_space<vmem>>, vector<8x64xf32>
    %c0_1 = arith.constant 0 : index
    %c128 = arith.constant 128 : index
    %1 = vector.load %arg0[%c0_1, %c128] : memref<8x768xf32, #tpu.memory_space<vmem>>, vector<8x16xf32>
    %c0_2 = arith.constant 0 : index
    %c256 = arith.constant 256 : index
    %2 = vector.load %arg0[%c0_2, %c256] : memref<8x768xf32, #tpu.memory_space<vmem>>, vector<8x512xf32>
    %c0_3 = arith.constant 0 : index
    %c0_4 = arith.constant 0 : index
    %3 = vector.load %arg1[%c0_3, %c0_4] : memref<80x512xbf16, #tpu.memory_space<vmem>>, vector<64x512xbf16>
    %c64 = arith.constant 64 : index
    %c0_5 = arith.constant 0 : index
    %4 = vector.load %arg1[%c64, %c0_5] : memref<80x512xbf16, #tpu.memory_space<vmem>>, vector<16x512xbf16>
    %c0_6 = arith.constant 0 : index
    %c0_7 = arith.constant 0 : index
    %5 = vector.load %arg2[%c0_6, %c0_7] : memref<512x256xbf16, #tpu.memory_space<vmem>>, vector<512x32xbf16>
    %c0_8 = arith.constant 0 : index
    %c128_9 = arith.constant 128 : index
    %6 = vector.load %arg2[%c0_8, %c128_9] : memref<512x256xbf16, #tpu.memory_space<vmem>>, vector<512x64xbf16>
    %c0_10 = arith.constant 0 : index
    %c0_11 = arith.constant 0 : index
    %7 = vector.load %arg3[%c0_10, %c0_11] : memref<1x1280xf32, #tpu.memory_space<vmem>>, vector<1x512xf32>
    %c0_12 = arith.constant 0 : index
    %c512 = arith.constant 512 : index
    %8 = vector.load %arg3[%c0_12, %c512] : memref<1x1280xf32, #tpu.memory_space<vmem>>, vector<1x32xf32>
    %c0_13 = arith.constant 0 : index
    %c640 = arith.constant 640 : index
    %9 = vector.load %arg3[%c0_13, %c640] : memref<1x1280xf32, #tpu.memory_space<vmem>>, vector<1x512xf32>
    %c0_14 = arith.constant 0 : index
    %c1152 = arith.constant 1152 : index
    %10 = vector.load %arg3[%c0_14, %c1152] : memref<1x1280xf32, #tpu.memory_space<vmem>>, vector<1x64xf32>
    %11 = arith.truncf %0 : vector<8x64xf32> to vector<8x64xbf16>
    %cst = arith.constant dense<0.000000e+00> : vector<8x512xf32>
    %12 = tpu.matmul %11, %3, %cst {dimension_numbers = #tpu.dot_dimension_numbers<[1], [0], [0], [1], [0, 0, 1, 1], [], []>} : vector<8x64xbf16>, vector<64x512xbf16>, vector<8x512xf32> -> vector<8x512xf32>
    %13 = vector.broadcast %7 : vector<1x512xf32> to vector<8x512xf32>
    %14 = arith.addf %12, %13 : vector<8x512xf32>
    %cst_15 = arith.constant 0.000000e+00 : f32
    %15 = vector.broadcast %cst_15 : f32 to vector<8x512xf32>
    %16 = arith.cmpf ogt, %14, %15 : vector<8x512xf32>
    %cst_16 = arith.constant 0.00999999977 : f32
    %17 = vector.broadcast %cst_16 : f32 to vector<8x512xf32>
    %18 = arith.mulf %17, %14 : vector<8x512xf32>
    %19 = arith.select %16, %14, %18 : vector<8x512xi1>, vector<8x512xf32>
    %20 = arith.mulf %19, %2 : vector<8x512xf32>
    %cst_17 = arith.constant 1.250000e+00 : f32
    %21 = vector.broadcast %cst_17 : f32 to vector<8x512xf32>
    %22 = arith.mulf %20, %21 : vector<8x512xf32>
    %23 = arith.truncf %22 : vector<8x512xf32> to vector<8x512xbf16>
    %cst_18 = arith.constant dense<0.000000e+00> : vector<8x32xf32>
    %24 = tpu.matmul %23, %5, %cst_18 {dimension_numbers = #tpu.dot_dimension_numbers<[1], [0], [0], [1], [0, 0, 1, 1], [], []>} : vector<8x512xbf16>, vector<512x32xbf16>, vector<8x32xf32> -> vector<8x32xf32>
    %25 = vector.broadcast %8 : vector<1x32xf32> to vector<8x32xf32>
    %26 = arith.addf %24, %25 : vector<8x32xf32>
    %27 = vector.extract_strided_slice %26 {offsets = [0, 0], sizes = [8, 16], strides = [1, 1]} : vector<8x32xf32> to vector<8x16xf32>
    %28 = vector.extract_strided_slice %26 {offsets = [0, 16], sizes = [8, 16], strides = [1, 1]} : vector<8x32xf32> to vector<8x16xf32>
    %cst_19 = arith.constant 5.000000e-01 : f32
    %29 = vector.broadcast %cst_19 : f32 to vector<8x16xf32>
    %30 = arith.mulf %29, %28 : vector<8x16xf32>
    %31 = math.exp %30 : vector<8x16xf32>
    %32 = arith.mulf %1, %31 : vector<8x16xf32>
    %33 = arith.addf %27, %32 : vector<8x16xf32>
    %34 = arith.truncf %33 : vector<8x16xf32> to vector<8x16xbf16>
    %cst_20 = arith.constant dense<0.000000e+00> : vector<8x512xf32>
    %35 = tpu.matmul %34, %4, %cst_20 {dimension_numbers = #tpu.dot_dimension_numbers<[1], [0], [0], [1], [0, 0, 1, 1], [], []>} : vector<8x16xbf16>, vector<16x512xbf16>, vector<8x512xf32> -> vector<8x512xf32>
    %36 = vector.broadcast %9 : vector<1x512xf32> to vector<8x512xf32>
    %37 = arith.addf %35, %36 : vector<8x512xf32>
    %cst_21 = arith.constant 0.000000e+00 : f32
    %38 = vector.broadcast %cst_21 : f32 to vector<8x512xf32>
    %39 = arith.cmpf ogt, %37, %38 : vector<8x512xf32>
    %cst_22 = arith.constant 0.00999999977 : f32
    %40 = vector.broadcast %cst_22 : f32 to vector<8x512xf32>
    %41 = arith.mulf %40, %37 : vector<8x512xf32>
    %42 = arith.select %39, %37, %41 : vector<8x512xi1>, vector<8x512xf32>
    %43 = arith.truncf %42 : vector<8x512xf32> to vector<8x512xbf16>
    %cst_23 = arith.constant dense<0.000000e+00> : vector<8x64xf32>
    %44 = tpu.matmul %43, %6, %cst_23 {dimension_numbers = #tpu.dot_dimension_numbers<[1], [0], [0], [1], [0, 0, 1, 1], [], []>} : vector<8x512xbf16>, vector<512x64xbf16>, vector<8x64xf32> -> vector<8x64xf32>
    %45 = vector.broadcast %10 : vector<1x64xf32> to vector<8x64xf32>
    %46 = arith.addf %44, %45 : vector<8x64xf32>
    %47 = arith.negf %46 : vector<8x64xf32>
    %48 = math.exp %47 : vector<8x64xf32>
    %cst_24 = arith.constant 1.000000e+00 : f32
    %49 = vector.broadcast %cst_24 : f32 to vector<8x64xf32>
    %50 = arith.addf %49, %48 : vector<8x64xf32>
    %51 = arith.divf %49, %50 : vector<8x64xf32>
    %c0_25 = arith.constant 0 : index
    %c0_26 = arith.constant 0 : index
    %52 = vector.load %arg4[%c0_25, %c0_26] : memref<8x64xf32, #tpu.memory_space<vmem>>, vector<8x64xf32>
    tpu.vector_store %arg4[%c0_25, %c0_26], %51 {strides = array<i32>} : memref<8x64xf32, #tpu.memory_space<vmem>>, vector<8x64xf32>,
    %c0_27 = arith.constant 0 : index
    %c0_28 = arith.constant 0 : index
    %53 = vector.load %arg5[%c0_27, %c0_28] : memref<8x32xf32, #tpu.memory_space<vmem>>, vector<8x32xf32>
    tpu.vector_store %arg5[%c0_27, %c0_28], %26 {strides = array<i32>} : memref<8x32xf32, #tpu.memory_space<vmem>>, vector<8x32xf32>,
    return
  }
}

</mosaic_0001>

<bundles_post_ra>
// kernel: vae_forward.1
= control target key start
LH: loop header
LB: loop body
LE: loop exit
PB: predicated region body
PF: predicated region fallthrough
CT: control target
= control target key end

     0   :  { %11 = vsyncpa [#allocation3], 0  ;;  %s1643_s0 = inlined_call_operand.vmem [shape: f32[8,768], index: 0, kind: input, shape index: {}]   ;;  %s1644_s1 = inlined_call_operand.hbm [shape: bf16[80,512], index: 1, kind: input, shape index: {}]   ;;  %s1645_s2 = inlined_call_operand.hbm [shape: bf16[512,256], index: 2, kind: input, shape index: {}]   ;;  %s1646_s3 = inlined_call_operand.vmem [shape: f32[1,1280], index: 3, kind: input, shape index: {}]   ;;  %s1647_s4 = inlined_call_operand.hbm [shape: f32[8,64], index: 4, kind: output, shape index: {0}]   ;;  %s1648_s5 = inlined_call_operand.vmem [shape: f32[8,32], index: 5, kind: output, shape index: {1}]  }
   0x1   :  { %12 = vsyncpa [#allocation6], 0 }
   0x2   :  { %13 = vsyncpa [#allocation4], 0  ;;  %s20_s20 = sshll.u32 %s1644_s1, 4  ;;  %s1553_s21 = smov [#allocation2]   ;;  %s21_s20 = int_to_ptr.hbm [resolvable:$true] %s20_s20 }
   0x3   :  { %s22_s22 = sshll.u32 %s1553_s21, 4  ;;  %s33_s25 = sshll.u32 %s1645_s2, 4  ;;  %s23_s22 = int_to_ptr.vmem [resolvable:$true] %s22_s22  ;;  %s34_s25 = int_to_ptr.hbm [resolvable:$true] %s33_s25 }
   0x4   :  { %s1554_s26 = smov 256   ;;  %s1555_s27 = smov 16  }
   0x5   :  { %28 = dma.hbm_to_vmem [thread:$0]  %s21_s20, 2560, %s23_s22, [#allocation3], %s1554_s26, %s1554_s26, %s1555_s27  }
   0x6   :  { %s1556_s28 = smov [#allocation5]   ;;  %s1557_s30 = smov 128  }
   0x7   :  { %s35_s29 = sshll.u32 %s1556_s28, 4  ;;  %s1558_s6 = smov 8   ;;  %s36_s29 = int_to_ptr.vmem [resolvable:$true] %s35_s29 }
   0x8   :  { %41 = dma.hbm_to_vmem [thread:$0]  %s34_s25, 8192, %s36_s29, [#allocation6], %s1557_s30, %s1557_s30, %s1558_s6  }
   0x9   :  { %1547 = dma.done.wait [#allocation3], 2560  }
   0xa   :  { %1548 = vsyncadd [#allocation3], 4294964736 }
   0xb   :  { %1549 = dma.done.wait [#allocation6], 8192  }
   0xc   :  { %1550 = vsyncadd [#allocation6], 4294959104  ;;  %v1080_v0 = vld [vmem:[#allocation2 + $0x60] sm:$0xf]  ;;  %v1389_v1 = vld [vmem:[#allocation2 + $0x6c] sm:$0xf0] }
   0xd   :  { %v1387_v2 = vld [vmem:[#allocation2 + $0x64] sm:$0xf]  ;;  %v1081_v3 = vor.u32 %v1389_v1, %v1080_v0  ;;  %v1082_v4 = vld [vmem:[#allocation2 + $0x70] sm:$0xf0]  ;;  %v1088_v5 = vld [vmem:[#allocation2 + $0x68] sm:$0xf] }
   0xe   :  { %v1390_v6 = vld [vmem:[#allocation2 + $0x74] sm:$0xf0]  ;;  %v1085_v7 = vor.u32 %v1387_v2, %v1082_v4  ;;  %v1388_v9 = vld [vmem:[#allocation2 + $0x6c] sm:$0xf]  ;;  %v1090_v10 = vld [vmem:[#allocation2 + $0x78] sm:$0xf0] }
   0xf   :  { %v1089_v8 = vor.u32 %v1390_v6, %v1088_v5  ;;  %v1064_v11 = vld [vmem:[#allocation2 + $0x40] sm:$0xf]  ;;  %309 = vmatpush.bf16.msra.mxu0 %v1081_v3  ;;  %v1093_v12 = vor.u32 %v1388_v9, %v1090_v10  ;;  %v1385_v13 = vld [vmem:[#allocation2 + $0x4c] sm:$0xf0]  ;;  %v1383_v14 = vld [vmem:[#allocation2 + $0x44] sm:$0xf] }
  0x10   :  { %v1066_v15 = vld [vmem:[#allocation2 + $0x50] sm:$0xf0]  ;;  %322 = vmatpush.bf16.msra.mxu1 %v1085_v7  ;;  %v1065_v16 = vor.u32 %v1385_v13, %v1064_v11  ;;  %v1072_v18 = vld [vmem:[#allocation2 + $0x48] sm:$0xf]  ;;  %v1386_v19 = vld [vmem:[#allocation2 + $0x54] sm:$0xf0] }
  0x11   :  { %335 = vmatpush.bf16.msra.mxu2 %v1089_v8  ;;  %v1069_v17 = vor.u32 %v1383_v14, %v1066_v15  ;;  %v1384_v20 = vld [vmem:[#allocation2 + $0x4c] sm:$0xf]  ;;  %348 = vmatpush.bf16.msra.mxu3 %v1093_v12  ;;  %v1073_v21 = vor.u32 %v1386_v19, %v1072_v18  ;;  %v1074_v22 = vld [vmem:[#allocation2 + $0x58] sm:$0xf0]  ;;  %v1048_v23 = vld [vmem:[#allocation2 + $0x20] sm:$0xf] }
  0x12   :  { %v1381_v24 = vld [vmem:[#allocation2 + $0x2c] sm:$0xf0]  ;;  %v1077_v25 = vor.u32 %v1384_v20, %v1074_v22  ;;  %v1379_v26 = vld [vmem:[#allocation2 + $0x24] sm:$0xf]  ;;  %v1050_v27 = vld [vmem:[#allocation2 + $0x30] sm:$0xf0] }
  0x13   :  { %v1056_v28 = vld [vmem:[#allocation2 + $0x28] sm:$0xf]  ;;  %310 = vmatpush.bf16.msra.mxu0 %v1065_v16  ;;  %v1049_v29 = vor.u32 %v1381_v24, %v1048_v23  ;;  %v1382_v30 = vld [vmem:[#allocation2 + $0x34] sm:$0xf0]  ;;  %v1380_v31 = vld [vmem:[#allocation2 + $0x2c] sm:$0xf]  ;;  %v1053_v33 = vor.u32 %v1379_v26, %v1050_v27 }
  0x14   :  { %v1058_v32 = vld [vmem:[#allocation2 + $0x38] sm:$0xf0]  ;;  %323 = vmatpush.bf16.msra.mxu1 %v1069_v17  ;;  %v1057_v34 = vor.u32 %v1382_v30, %v1056_v28  ;;  %v1032_v35 = vld [vmem:[#allocation2] sm:$0xf]  ;;  %v1377_v36 = vld [vmem:[#allocation2 + $0xc] sm:$0xf0] }
  0x15   :  { %336 = vmatpush.bf16.msra.mxu2 %v1073_v21  ;;  %v1375_v37 = vld [vmem:[#allocation2 + $0x4] sm:$0xf]  ;;  %349 = vmatpush.bf16.msra.mxu3 %v1077_v25  ;;  %v1061_v38 = vor.u32 %v1380_v31, %v1058_v32  ;;  %v1034_v39 = vld [vmem:[#allocation2 + $0x10] sm:$0xf0]  ;;  %v1040_v40 = vld [vmem:[#allocation2 + $0x8] sm:$0xf]  ;;  %v1033_v45 = vor.u32 %v1377_v36, %v1032_v35 }
  0x16   :  { %v1378_v41 = vld [vmem:[#allocation2 + $0x14] sm:$0xf0]  ;;  %v1376_v42 = vld [vmem:[#allocation2 + $0xc] sm:$0xf]  ;;  %v1042_v43 = vld [vmem:[#allocation2 + $0x18] sm:$0xf0]  ;;  %v1037_v49 = vor.u32 %v1375_v37, %v1034_v39 }
  0x17   :  { %v53_v44 = vld [vmem:[%s1643_s0] sm:$0xff]  ;;  %311 = vmatpush.bf16.msra.mxu0 %v1049_v29  ;;  %v1128_v46 = vld [vmem:[#allocation5 + $0x70] sm:$0xf]  ;;  %v1402_v47 = vld [vmem:[#allocation5 + $0x74] sm:$0xf0]  ;;  %v1041_v50 = vor.u32 %v1378_v41, %v1040_v40  ;;  %v1045_v52 = vor.u32 %v1376_v42, %v1042_v43  ;;  %vm301_vm0 = vcmask 523264  }
  0x18   :  { %v1160_v48 = vld [vmem:[#allocation5 + $0xf0] sm:$0xf]  ;;  %324 = vmatpush.bf16.msra.mxu1 %v1053_v33  ;;  %v1410_v51 = vld [vmem:[#allocation5 + $0xf4] sm:$0xf0]  ;;  %v1129_v53 = vor.u32 %v1402_v47, %v1128_v46  ;;  %v1124_v54 = vld [vmem:[#allocation5 + $0x60] sm:$0xf]  ;;  %v211_v57 = vpack.c.bf16 %v53_v44, %v53_v44 }
  0x19   :  { %337 = vmatpush.bf16.msra.mxu2 %v1057_v34  ;;  %350 = vmatpush.bf16.msra.mxu3 %v1061_v38  ;;  %v1401_v55 = vld [vmem:[#allocation5 + $0x64] sm:$0xf0]  ;;  %v1192_v56 = vld [vmem:[#allocation5 + $0x170] sm:$0xf]  ;;  %v1161_v58 = vor.u32 %v1410_v51, %v1160_v48  ;;  %v1418_v59 = vld [vmem:[#allocation5 + $0x174] sm:$0xf0] }
  0x1a   :  { %v1224_v60 = vld [vmem:[#allocation5 + $0x1f0] sm:$0xf]  ;;  %v1426_v61 = vld [vmem:[#allocation5 + $0x1f4] sm:$0xf0]  ;;  %v1156_v62 = vld [vmem:[#allocation5 + $0xe0] sm:$0xf]  ;;  %v1193_v0 = vor.u32 %v1418_v59, %v1192_v56  ;;  %v1125_v1 = vor.u32 %v1401_v55, %v1124_v54 }
  0x1b   :  { %312 = vmatpush.bf16.msra.mxu0 %v1033_v45  ;;  %v1409_v63 = vld [vmem:[#allocation5 + $0xe4] sm:$0xf0]  ;;  %v1225_v2 = vor.u32 %v1426_v61, %v1224_v60  ;;  %v1120_v3 = vld [vmem:[#allocation5 + $0x50] sm:$0xf]  ;;  %v1188_v4 = vld [vmem:[#allocation5 + $0x160] sm:$0xf] }
  0x1c   :  { %325 = vmatpush.bf16.msra.mxu1 %v1037_v49  ;;  %v1417_v5 = vld [vmem:[#allocation5 + $0x164] sm:$0xf0]  ;;  %v1157_v6 = vor.u32 %v1409_v63, %v1156_v62  ;;  %v1400_v7 = vld [vmem:[#allocation5 + $0x54] sm:$0xf0]  ;;  %v1220_v8 = vld [vmem:[#allocation5 + $0x1e0] sm:$0xf] }
  0x1d   :  { %338 = vmatpush.bf16.msra.mxu2 %v1041_v50  ;;  %351 = vmatpush.bf16.msra.mxu3 %v1045_v52  ;;  %v1425_v9 = vld [vmem:[#allocation5 + $0x1e4] sm:$0xf0]  ;;  %v1152_v10 = vld [vmem:[#allocation5 + $0xd0] sm:$0xf]  ;;  %v1408_v11 = vld [vmem:[#allocation5 + $0xd4] sm:$0xf0]  ;;  %v1189_v12 = vor.u32 %v1417_v5, %v1188_v4  ;;  %v1121_v14 = vor.u32 %v1400_v7, %v1120_v3 }
  0x1e   :  { %1094 = vmatmul.msk.bf16.vlgmr.msra.gmra.mxu0 %vm301_vm0, %v211_v57  ;;  %v1116_v13 = vld [vmem:[#allocation5 + $0x40] sm:$0xf]  ;;  %v1221_v15 = vor.u32 %v1425_v9, %v1220_v8  ;;  %v1399_v16 = vld [vmem:[#allocation5 + $0x44] sm:$0xf0]  ;;  %v1184_v17 = vld [vmem:[#allocation5 + $0x150] sm:$0xf]  ;;  %v1153_v19 = vor.u32 %v1408_v11, %v1152_v10 }
  0x1f   :  { %576 = vmatpush.bf16.msrb.mxu0 %v1129_v53  ;;  %1095 = vmatmul.msk.bf16.vlgmr.msra.gmra.mxu1 %vm301_vm0, %v211_v57  ;;  %v1416_v18 = vld [vmem:[#allocation5 + $0x154] sm:$0xf0]  ;;  %v1148_v20 = vld [vmem:[#allocation5 + $0xc0] sm:$0xf]  ;;  %v1216_v21 = vld [vmem:[#allocation5 + $0x1d0] sm:$0xf]  ;;  %v1117_v25 = vor.u32 %v1399_v16, %v1116_v13 }
  0x20   :  { %589 = vmatpush.bf16.msrb.mxu1 %v1161_v58  ;;  %1096 = vmatmul.msk.bf16.vlgmr.msra.gmra.mxu2 %vm301_vm0, %v211_v57  ;;  %v1424_v22 = vld [vmem:[#allocation5 + $0x1d4] sm:$0xf0]  ;;  %v1407_v23 = vld [vmem:[#allocation5 + $0xc4] sm:$0xf0]  ;;  %v1185_v24 = vor.u32 %v1416_v18, %v1184_v17  ;;  %v1112_v27 = vld [vmem:[#allocation5 + $0x30] sm:$0xf] }
  0x21   :  { %1097 = vmatmul.msk.bf16.vlgmr.msra.gmra.mxu3 %vm301_vm0, %v211_v57  ;;  %602 = vmatpush.bf16.msrb.mxu2 %v1193_v0  ;;  %v1217_v26 = vor.u32 %v1424_v22, %v1216_v21  ;;  %v1180_v28 = vld [vmem:[#allocation5 + $0x140] sm:$0xf]  ;;  %v1415_v29 = vld [vmem:[#allocation5 + $0x144] sm:$0xf0]  ;;  %v1149_v30 = vor.u32 %v1407_v23, %v1148_v20  ;;  %v1398_v31 = vld [vmem:[#allocation5 + $0x34] sm:$0xf0] }
  0x22   :  { %615 = vmatpush.bf16.msrb.mxu3 %v1225_v2  ;;  %v1212_v32 = vld [vmem:[#allocation5 + $0x1c0] sm:$0xf]  ;;  %v1423_v33 = vld [vmem:[#allocation5 + $0x1c4] sm:$0xf0]  ;;  %v1144_v34 = vld [vmem:[#allocation5 + $0xb0] sm:$0xf]  ;;  %v1181_v36 = vor.u32 %v1415_v29, %v1180_v28  ;;  %v1113_v37 = vor.u32 %v1398_v31, %v1112_v27 }
  0x23   :  { %577 = vmatpush.bf16.msrb.mxu0 %v1125_v1  ;;  %v1406_v35 = vld [vmem:[#allocation5 + $0xb4] sm:$0xf0]  ;;  %v1213_v38 = vor.u32 %v1423_v33, %v1212_v32  ;;  %v1108_v40 = vld [vmem:[#allocation5 + $0x20] sm:$0xf]  ;;  %v1397_v41 = vld [vmem:[#allocation5 + $0x24] sm:$0xf0] }
  0x24   :  { %590 = vmatpush.bf16.msrb.mxu1 %v1157_v6  ;;  %v1145_v39 = vor.u32 %v1406_v35, %v1144_v34  ;;  %v1140_v42 = vld [vmem:[#allocation5 + $0xa0] sm:$0xf]  ;;  %v1109_v43 = vor.u32 %v1397_v41, %v1108_v40  ;;  %v1405_v44 = vld [vmem:[#allocation5 + $0xa4] sm:$0xf0]  ;;  %v1176_v46 = vld [vmem:[#allocation5 + $0x130] sm:$0xf] }
  0x25   :  { %603 = vmatpush.bf16.msrb.mxu2 %v1189_v12  ;;  %v1141_v45 = vor.u32 %v1405_v44, %v1140_v42  ;;  %v1414_v47 = vld [vmem:[#allocation5 + $0x134] sm:$0xf0]  ;;  %v1208_v48 = vld [vmem:[#allocation5 + $0x1b0] sm:$0xf]  ;;  %v1172_v58 = vld [vmem:[#allocation5 + $0x120] sm:$0xf] }
  0x26   :  { %616 = vmatpush.bf16.msrb.mxu3 %v1221_v15  ;;  %v1177_v49 = vor.u32 %v1414_v47, %v1176_v46  ;;  %v1422_v50 = vld [vmem:[#allocation5 + $0x1b4] sm:$0xf0]  ;;  %v1104_v52 = vld [vmem:[#allocation5 + $0x10] sm:$0xf]  ;;  %v1413_v59 = vld [vmem:[#allocation5 + $0x124] sm:$0xf0] }
  0x27   :  { %578 = vmatpush.bf16.msrb.mxu0 %v1121_v14  ;;  %v1209_v51 = vor.u32 %v1422_v50, %v1208_v48  ;;  %v1396_v53 = vld [vmem:[#allocation5 + $0x14] sm:$0xf0]  ;;  %v1136_v54 = vld [vmem:[#allocation5 + $0x90] sm:$0xf]  ;;  %v1173_v60 = vor.u32 %v1413_v59, %v1172_v58  ;;  %v1204_v61 = vld [vmem:[#allocation5 + $0x1a0] sm:$0xf] }
  0x28   :  { %591 = vmatpush.bf16.msrb.mxu1 %v1153_v19  ;;  %v1105_v55 = vor.u32 %v1396_v53, %v1104_v52  ;;  %v1404_v56 = vld [vmem:[#allocation5 + $0x94] sm:$0xf0]  ;;  %v1421_v62 = vld [vmem:[#allocation5 + $0x1a4] sm:$0xf0]  ;;  %v1100_v0 = vld [vmem:[#allocation5] sm:$0xf] }
  0x29   :  { %604 = vmatpush.bf16.msrb.mxu2 %v1185_v24  ;;  %v1137_v57 = vor.u32 %v1404_v56, %v1136_v54  ;;  %v1205_v63 = vor.u32 %v1421_v62, %v1204_v61  ;;  %v1395_v1 = vld [vmem:[#allocation5 + $0x4] sm:$0xf0]  ;;  %v1132_v2 = vld [vmem:[#allocation5 + $0x80] sm:$0xf]  ;;  %v1168_v6 = vld [vmem:[#allocation5 + $0x110] sm:$0xf] }
  0x2a   :  { %617 = vmatpush.bf16.msrb.mxu3 %v1217_v26  ;;  %v1101_v3 = vor.u32 %v1395_v1, %v1100_v0  ;;  %v1403_v4 = vld [vmem:[#allocation5 + $0x84] sm:$0xf0]  ;;  %v1412_v7 = vld [vmem:[#allocation5 + $0x114] sm:$0xf0]  ;;  %v1200_v8 = vld [vmem:[#allocation5 + $0x190] sm:$0xf] }
  0x2b   :  { %579 = vmatpush.bf16.msrb.mxu0 %v1117_v25  ;;  %v1133_v5 = vor.u32 %v1403_v4, %v1132_v2  ;;  %v1169_v9 = vor.u32 %v1412_v7, %v1168_v6  ;;  %v1420_v10 = vld [vmem:[#allocation5 + $0x194] sm:$0xf0]  ;;  %v1164_v12 = vld [vmem:[#allocation5 + $0x100] sm:$0xf]  ;;  %v1411_v13 = vld [vmem:[#allocation5 + $0x104] sm:$0xf0] }
  0x2c   :  { %592 = vmatpush.bf16.msrb.mxu1 %v1149_v30  ;;  %v1201_v11 = vor.u32 %v1420_v10, %v1200_v8  ;;  %v1196_v14 = vld [vmem:[#allocation5 + $0x180] sm:$0xf]  ;;  %v1165_v15 = vor.u32 %v1411_v13, %v1164_v12  ;;  %v1419_v16 = vld [vmem:[#allocation5 + $0x184] sm:$0xf0]  ;;  %v55_v26 = vld [vmem:[%s1643_s0 + $0x10] sm:$0xff]  ;;  %vm1006_vm5 = vcmask 261120  }
  0x2d   :  { %605 = vmatpush.bf16.msrb.mxu2 %v1181_v36  ;;  %v1197_v17 = vor.u32 %v1419_v16, %v1196_v14  ;;  %v207_v18 = vld [vmem:[%s1646_s3] sm:$0xf]  ;;  %v56_v29 = vld [vmem:[%s1643_s0 + $0x18] sm:$0xff]  ;;  %v58_v48 = vld [vmem:[%s1643_s0 + $0x28] sm:$0xff]  ;;  %s1559_s21 = smov 112   ;;  %vm667_vm6 = vcmask 130048  }
  0x2e   :  { %618 = vmatpush.bf16.msrb.mxu3 %v1213_v38  ;;  %v213_v19 = vperm.slane %v207_v18, 0  ;;  %v214_v20 = vperm.slane %v207_v18, 1  ;;  %v215_v28 = vperm.slane %v207_v18, 2  ;;  %v216_v31 = vperm.slane %v207_v18, 3  ;;  %v1236_v59 = vld [vmem:[#allocation2 + $0x88] sm:$0xf] }
  0x2f   :  { %580 = vmatpush.bf16.msrb.mxu0 %v1113_v37  ;;  %v1392_v61 = vld [vmem:[#allocation2 + $0x8c] sm:$0xf]  ;;  %v1228_v0 = vld [vmem:[#allocation2 + $0x80] sm:$0xf]  ;;  %v1393_v1 = vld [vmem:[#allocation2 + $0x8c] sm:$0xf0] }
  0x30   :  { %593 = vmatpush.bf16.msrb.mxu1 %v1145_v39  ;;  %v1467_v6 = vld [vmem:[%s1646_s3 + $0x4] ss:$0 sm:$0xff]  ;;  %s1015_s29 = sshll.u32 %s1647_s4, 4  ;;  %s1016_s29 = int_to_ptr.hbm [resolvable:$true] %s1015_s29 }
  0x31   :  { %606 = vmatpush.bf16.msrb.mxu2 %v1177_v49 }
  0x32   :  { %619 = vmatpush.bf16.msrb.mxu3 %v1209_v51 }
  0x33   :  { %581 = vmatpush.bf16.msrb.mxu0 %v1109_v43 }
  0x34   :  { %594 = vmatpush.bf16.msrb.mxu1 %v1141_v45  ;;  %v57_v45 = vld [vmem:[%s1643_s0 + $0x20] sm:$0xff] }
  0x35   :  { %607 = vmatpush.bf16.msrb.mxu2 %v1173_v60  ;;  %v1394_v60 = vld [vmem:[#allocation2 + $0x94] sm:$0xf0] }
  0x36   :  { %620 = vmatpush.bf16.msrb.mxu3 %v1205_v63  ;;  %v1237_v62 = vor.u32 %v1394_v60, %v1236_v59  ;;  %v1238_v63 = vld [vmem:[#allocation2 + $0x98] sm:$0xf0]  ;;  %v1439_v59 = vld [vmem:[#allocation5 + $0xc8] sm:$0xf0] }
  0x37   :  { %582 = vmatpush.bf16.msrb.mxu0 %v1105_v55  ;;  %v1241_v2 = vor.u32 %v1392_v61, %v1238_v63  ;;  %v1456_v60 = vld [vmem:[#allocation5 + $0x1d8] sm:$0xf0]  ;;  %v1328_v63 = vld [vmem:[#allocation5 + $0x144] sm:$0xf] }
  0x38   :  { %595 = vmatpush.bf16.msrb.mxu1 %v1137_v57 }
  0x39   :  { %608 = vmatpush.bf16.msrb.mxu2 %v1169_v9 }
  0x3a   :  { %621 = vmatpush.bf16.msrb.mxu3 %v1201_v11 }
  0x3b   :  { %583 = vmatpush.bf16.msrb.mxu0 %v1101_v3  ;;  %v1229_v3 = vor.u32 %v1393_v1, %v1228_v0  ;;  %v1447_v1 = vld [vmem:[#allocation5 + $0x148] sm:$0xf0] }
  0x3c   :  { %596 = vmatpush.bf16.msrb.mxu1 %v1133_v5 }
  0x3d   :  { %609 = vmatpush.bf16.msrb.mxu2 %v1165_v15 }
  0x3e   :  { %622 = vmatpush.bf16.msrb.mxu3 %v1197_v17 }
  0x3f   :  { %678 = vmatpush.bf16.msra.mxu0 %v1229_v3  ;;  %v1455_v3 = vld [vmem:[#allocation5 + $0x1c8] sm:$0xf0] }
  0x41   :  { %704 = vmatpush.bf16.msra.mxu2 %v1237_v62 }
  0x42   :  { %717 = vmatpush.bf16.msra.mxu3 %v1241_v2  ;;  %v1360_v2 = vld [vmem:[#allocation5 + $0x1c4] sm:$0xf] }
  0x9b   :  { %v314_v21 = vpop.f32.mrf.mxu0 }
  0x9c   :  { %v315_v22 = vadd.f32 %v314_v21, %v213_v19  ;;  %v327_v23 = vpop.f32.mrf.mxu1  ;;  %v1230_v21 = vld [vmem:[#allocation2 + $0x90] sm:$0xf0] }
  0x9d   :  { %v328_v24 = vadd.f32 %v327_v23, %v214_v20  ;;  %v1391_v20 = vld [vmem:[#allocation2 + $0x84] sm:$0xf]  ;;  %v1276_v23 = vld [vmem:[#allocation5 + $0x74] sm:$0xf] }
  0x9e   :  { %vm357_vm1 = vcmp.gt.f32.partialorder %v315_v22, 0.0  ;;  %v361_v25 = vmul.f32 0.01, %v315_v22 }
  0x9f   :  { %vm358_vm2 = vcmp.gt.f32.partialorder %v328_v24, 0.0  ;;  %v362_v27 = vmul.f32 0.01, %v328_v24 }
  0xa0   :  { %v365_v30 = vsel %vm357_vm1, %v315_v22, %v361_v25  ;;  %v1233_v22 = vor.u32 %v1391_v20, %v1230_v21  ;;  %v1308_v25 = vld [vmem:[#allocation5 + $0xf4] sm:$0xf]  ;;  %v1288_v20 = vld [vmem:[#allocation5 + $0xa4] sm:$0xf]  ;;  %v1437_v21 = vld [vmem:[#allocation5 + $0xa8] sm:$0xf0] }
  0xa1   :  { %v366_v32 = vsel %vm358_vm2, %v328_v24, %v362_v27  ;;  %v369_v33 = vmul.f32 %v365_v30, %v55_v26  ;;  %v1434_v24 = vld [vmem:[#allocation5 + $0x78] sm:$0xf0] }
  0xa2   :  { %v370_v35 = vmul.f32 %v366_v32, %v56_v29  ;;  %691 = vmatpush.bf16.msra.mxu1 %v1233_v22  ;;  %v1277_v26 = vor.u32 %v1434_v24, %v1276_v23  ;;  %v1442_v27 = vld [vmem:[#allocation5 + $0xf8] sm:$0xf0]  ;;  %v1433_v29 = vld [vmem:[#allocation5 + $0x68] sm:$0xf0] }
  0xa3   :  { %v340_v34 = vpop.f32.mrf.mxu2  ;;  %v316_v38 = vpop.f32.mrf.mxu0  ;;  %v373_v39 = vmul.f32 1.25, %v369_v33  ;;  %v1309_v30 = vor.u32 %v1442_v27, %v1308_v25  ;;  %v1441_v32 = vld [vmem:[#allocation5 + $0xe8] sm:$0xf0]  ;;  %v1340_v33 = vld [vmem:[#allocation5 + $0x174] sm:$0xf]  ;;  %v1289_v25 = vor.u32 %v1437_v21, %v1288_v20 }
  0xa4   :  { %v341_v36 = vadd.f32 %v340_v34, %v215_v28  ;;  %v353_v37 = vpop.f32.mrf.mxu3  ;;  %v329_v41 = vpop.f32.mrf.mxu1  ;;  %v374_v42 = vmul.f32 1.25, %v370_v35  ;;  %v1272_v28 = vld [vmem:[#allocation5 + $0x64] sm:$0xf]  ;;  %v1450_v35 = vld [vmem:[#allocation5 + $0x178] sm:$0xf0] }
  0xa5   :  { %v354_v40 = vadd.f32 %v353_v37, %v216_v31  ;;  %v377_v44 = vpack.c.bf16 %v373_v39, %v373_v39  ;;  %v1304_v31 = vld [vmem:[#allocation5 + $0xe4] sm:$0xf]  ;;  %v1273_v34 = vor.u32 %v1433_v29, %v1272_v28  ;;  %v1458_v37 = vld [vmem:[#allocation5 + $0x1f8] sm:$0xf0]  ;;  %v1341_v39 = vor.u32 %v1450_v35, %v1340_v33  ;;  %v1268_v41 = vld [vmem:[#allocation5 + $0x54] sm:$0xf] }
  0xa6   :  { %vm359_vm3 = vcmp.gt.f32.partialorder %v341_v36, 0.0  ;;  %v363_v43 = vmul.f32 0.01, %v341_v36  ;;  %v378_v47 = vpack.c.bf16 %v374_v42, %v374_v42  ;;  %v1305_v38 = vor.u32 %v1441_v32, %v1304_v31  ;;  %v1432_v42 = vld [vmem:[#allocation5 + $0x58] sm:$0xf0] }
  0xa7   :  { %vm360_vm4 = vcmp.gt.f32.partialorder %v354_v40, 0.0  ;;  %v364_v46 = vmul.f32 0.01, %v354_v40  ;;  %584 = vmatmul.bf16.vlgmr.msrb.gmra.mxu0 %v377_v44  ;;  %v1440_v44 = vld [vmem:[#allocation5 + $0xd8] sm:$0xf0] }
  0xa8   :  { %v367_v49 = vsel %vm359_vm3, %v341_v36, %v363_v43  ;;  %597 = vmatmul.bf16.vlgmr.msrb.gmra.mxu1 %v378_v47  ;;  %934 = vmatpush.bf16.msrb.mxu0 %v1277_v26  ;;  %v1372_v36 = vld [vmem:[#allocation5 + $0x1f4] sm:$0xf]  ;;  %v54_v26 = vld [vmem:[%s1643_s0 + $0x8] sm:$0xff]  ;;  %v1428_v32 = vld [vmem:[#allocation5 + $0x18] sm:$0xf0] }
  0xa9   :  { %v368_v50 = vsel %vm360_vm4, %v354_v40, %v364_v46  ;;  %v371_v51 = vmul.f32 %v367_v49, %v57_v45  ;;  %947 = vmatpush.bf16.msrb.mxu1 %v1309_v30  ;;  %v1373_v40 = vor.u32 %v1458_v37, %v1372_v36  ;;  %v1300_v43 = vld [vmem:[#allocation5 + $0xd4] sm:$0xf]  ;;  %v1336_v45 = vld [vmem:[#allocation5 + $0x164] sm:$0xf]  ;;  %v1449_v46 = vld [vmem:[#allocation5 + $0x168] sm:$0xf0] }
  0xaa   :  { %v372_v52 = vmul.f32 %v368_v50, %v58_v48  ;;  %v1337_v47 = vor.u32 %v1449_v46, %v1336_v45  ;;  %v1368_v48 = vld [vmem:[#allocation5 + $0x1e4] sm:$0xf]  ;;  %v1457_v49 = vld [vmem:[#allocation5 + $0x1e8] sm:$0xf0]  ;;  %v1269_v50 = vor.u32 %v1432_v42, %v1268_v41  ;;  %v1252_v31 = vld [vmem:[#allocation5 + $0x14] sm:$0xf] }
  0xab   :  { %v342_v53 = vpop.f32.mrf.mxu2  ;;  %v375_v54 = vmul.f32 1.25, %v371_v51  ;;  %v1369_v51 = vor.u32 %v1457_v49, %v1368_v48  ;;  %v1284_v33 = vld [vmem:[#allocation5 + $0x94] sm:$0xf]  ;;  %v1436_v35 = vld [vmem:[#allocation5 + $0x98] sm:$0xf0] }
  0xac   :  { %v355_v55 = vpop.f32.mrf.mxu3  ;;  %v376_v56 = vmul.f32 1.25, %v372_v52  ;;  %935 = vmatpush.bf16.msrb.mxu0 %v1273_v34  ;;  %v1264_v52 = vld [vmem:[#allocation5 + $0x44] sm:$0xf]  ;;  %v1431_v53 = vld [vmem:[#allocation5 + $0x48] sm:$0xf0]  ;;  %v1253_v34 = vor.u32 %v1428_v32, %v1252_v31  ;;  %v1285_v36 = vor.u32 %v1436_v35, %v1284_v33 }
  0xad   :  { %v379_v57 = vpack.c.bf16 %v375_v54, %v375_v54  ;;  %948 = vmatpush.bf16.msrb.mxu1 %v1305_v38  ;;  %v1301_v54 = vor.u32 %v1440_v44, %v1300_v43  ;;  %v1332_v55 = vld [vmem:[#allocation5 + $0x154] sm:$0xf]  ;;  %v1265_v0 = vor.u32 %v1431_v53, %v1264_v52  ;;  %v1320_v37 = vld [vmem:[#allocation5 + $0x124] sm:$0xf]  ;;  %v1445_v38 = vld [vmem:[#allocation5 + $0x128] sm:$0xf0] }
  0xae   :  { %v380_v58 = vpack.c.bf16 %v376_v56, %v376_v56  ;;  %v1448_v56 = vld [vmem:[#allocation5 + $0x158] sm:$0xf0]  ;;  %v1453_v41 = vld [vmem:[#allocation5 + $0x1a8] sm:$0xf0]  ;;  %v1248_v42 = vld [vmem:[#allocation5 + $0x4] sm:$0xf] }
  0xaf   :  { %610 = vmatmul.bf16.vlgmr.msrb.gmra.mxu2 %v379_v57  ;;  %v1364_v57 = vld [vmem:[#allocation5 + $0x1d4] sm:$0xf]  ;;  %v1333_v61 = vor.u32 %v1448_v56, %v1332_v55  ;;  %v1427_v43 = vld [vmem:[#allocation5 + $0x8] sm:$0xf0]  ;;  %v1280_v44 = vld [vmem:[#allocation5 + $0x84] sm:$0xf] }
  0xb0   :  { %623 = vmatmul.bf16.vlgmr.msrb.gmra.mxu3 %v380_v58  ;;  %960 = vmatpush.bf16.msrb.mxu2 %v1341_v39  ;;  %v1296_v58 = vld [vmem:[#allocation5 + $0xc4] sm:$0xf]  ;;  %v1365_v62 = vor.u32 %v1456_v60, %v1364_v57  ;;  %v1249_v45 = vor.u32 %v1427_v43, %v1248_v42  ;;  %v1435_v46 = vld [vmem:[#allocation5 + $0x88] sm:$0xf0]  ;;  %v1316_v48 = vld [vmem:[#allocation5 + $0x114] sm:$0xf] }
  0xb1   :  { %973 = vmatpush.bf16.msrb.mxu3 %v1373_v40  ;;  %936 = vmatpush.bf16.msrb.mxu0 %v1269_v50  ;;  %v1352_v39 = vld [vmem:[#allocation5 + $0x1a4] sm:$0xf]  ;;  %v1321_v40 = vor.u32 %v1445_v38, %v1320_v37  ;;  %v1444_v49 = vld [vmem:[#allocation5 + $0x118] sm:$0xf0]  ;;  %v1348_v50 = vld [vmem:[#allocation5 + $0x194] sm:$0xf] }
  0xb2   :  { %949 = vmatpush.bf16.msrb.mxu1 %v1301_v54  ;;  %v1452_v52 = vld [vmem:[#allocation5 + $0x198] sm:$0xf0]  ;;  %v1312_v54 = vld [vmem:[#allocation5 + $0x104] sm:$0xf]  ;;  %v1443_v55 = vld [vmem:[#allocation5 + $0x108] sm:$0xf0] }
  0xb3   :  { %v1349_v53 = vor.u32 %v1452_v52, %v1348_v50  ;;  %v1344_v56 = vld [vmem:[#allocation5 + $0x184] sm:$0xf]  ;;  %v1313_v57 = vor.u32 %v1443_v55, %v1312_v54 }
  0xb4   :  { %961 = vmatpush.bf16.msrb.mxu2 %v1337_v47  ;;  %v1281_v47 = vor.u32 %v1435_v46, %v1280_v44  ;;  %v209_v60 = vld [vmem:[%s1646_s3 + $0x5] sm:$0xf] }
  0xb5   :  { %974 = vmatpush.bf16.msrb.mxu3 %v1369_v51  ;;  %937 = vmatpush.bf16.msrb.mxu0 %v1265_v0  ;;  %v1317_v51 = vor.u32 %v1444_v49, %v1316_v48 }
  0xb8   :  { %962 = vmatpush.bf16.msrb.mxu2 %v1333_v61  ;;  %v639_v61 = vperm.slane %v209_v60, 0 }
  0xb9   :  { %975 = vmatpush.bf16.msrb.mxu3 %v1365_v62  ;;  %v640_v62 = vperm.slane %v209_v60, 1 }
 0x124   :  { %v585_v4 = vpop.f32.mrf.mxu0 }
 0x125   :  { %v598_v5 = vpop.f32.mrf.mxu1  ;;  %v586_v7 = vadd.f32 %v1467_v6, %v585_v4  ;;  %v1297_v4 = vor.u32 %v1439_v59, %v1296_v58  ;;  %v1430_v6 = vld [vmem:[#allocation5 + $0x38] sm:$0xf0]  ;;  %v1451_v58 = vld [vmem:[#allocation5 + $0x188] sm:$0xf0] }
 0x126   :  { %v1345_v59 = vor.u32 %v1451_v58, %v1344_v56 }
 0x127   :  { %v599_v10 = vadd.f32 %v598_v5, %v586_v7  ;;  %v1260_v5 = vld [vmem:[#allocation5 + $0x34] sm:$0xf]  ;;  %950 = vmatpush.bf16.msrb.mxu1 %v1297_v4 }
 0x128   :  { %v1292_v7 = vld [vmem:[#allocation5 + $0xb4] sm:$0xf] }
 0x12c   :  { %v587_v8 = vpop.f32.mrf.mxu0 }
 0x12d   :  { %v600_v9 = vpop.f32.mrf.mxu1  ;;  %v1438_v8 = vld [vmem:[#allocation5 + $0xb8] sm:$0xf0] }
 0x12e   :  { %v1329_v9 = vor.u32 %v1447_v1, %v1328_v63 }
 0x130   :  { %963 = vmatpush.bf16.msrb.mxu2 %v1329_v9 }
 0x132   :  { %v611_v11 = vpop.f32.mrf.mxu2 }
 0x133   :  { %v612_v12 = vadd.f32 %v611_v11, %v599_v10  ;;  %v624_v13 = vpop.f32.mrf.mxu3  ;;  %v1361_v10 = vor.u32 %v1455_v3, %v1360_v2  ;;  %v1324_v11 = vld [vmem:[#allocation5 + $0x134] sm:$0xf] }
 0x135   :  { %v1622_v14 = vadd.f32 %v624_v13, %v612_v12  ;;  %v1261_v12 = vor.u32 %v1430_v6, %v1260_v5  ;;  %v1446_v13 = vld [vmem:[#allocation5 + $0x138] sm:$0xf0]  ;;  %976 = vmatpush.bf16.msrb.mxu3 %v1361_v10  ;;  %v641_v5 = vperm.slane %v209_v60, 2  ;;  %v642_v6 = vperm.slane %v209_v60, 3 }
 0x136   :  { %v1325_v22 = vor.u32 %v1446_v13, %v1324_v11 }
 0x137   :  { %v628_v15 = vmul.f32 0.5, %v1622_v14  ;;  %1007 = vst.msk [vmem:[%s1648_s5] sm:$0xff] %vm1006_vm5, %v1622_v14  ;;  %938 = vmatpush.bf16.msrb.mxu0 %v1261_v12 }
 0x138   :  { %964 = vmatpush.bf16.msrb.mxu2 %v1325_v22 }
 0x139   :  { %v629_v16 = vmul.f32 1.442695, %v628_v15  ;;  %v1356_v15 = vld [vmem:[#allocation5 + $0x1b4] sm:$0xf] }
 0x13a   :  { %v613_v17 = vpop.f32.mrf.mxu2 }
 0x13b   :  { %1469 = vpow2.f32 %v629_v16  ;;  %v626_v18 = vpop.f32.mrf.mxu3  ;;  %v1454_v16 = vld [vmem:[#allocation5 + $0x1b8] sm:$0xf0]  ;;  %v1293_v17 = vor.u32 %v1438_v8, %v1292_v7 }
 0x13c   :  { %v1256_v18 = vld [vmem:[#allocation5 + $0x24] sm:$0xf]  ;;  %v1357_v23 = vor.u32 %v1454_v16, %v1356_v15  ;;  %965 = vmatpush.bf16.msrb.mxu2 %v1321_v40 }
 0x13d   :  { %951 = vmatpush.bf16.msrb.mxu1 %v1293_v17 }
 0x13e   :  { %977 = vmatpush.bf16.msrb.mxu3 %v1357_v23 }
 0x140   :  { %966 = vmatpush.bf16.msrb.mxu2 %v1317_v51 }
 0x141   :  { %v1470_v19 = vpop.eup %1469  ;;  %952 = vmatpush.bf16.msrb.mxu1 %v1289_v25 }
 0x142   :  { %632 = vrot.lane.b32.xlu0 %v1470_v19, %s1559_s21  ;;  %v1429_v19 = vld [vmem:[#allocation5 + $0x28] sm:$0xf0] }
 0x143   :  { %v1257_v24 = vor.u32 %v1429_v19, %v1256_v18 }
 0x144   :  { %967 = vmatpush.bf16.msrb.mxu2 %v1313_v57 }
 0x145   :  { %939 = vmatpush.bf16.msrb.mxu0 %v1257_v24  ;;  %953 = vmatpush.bf16.msrb.mxu1 %v1285_v36 }
 0x149   :  { %940 = vmatpush.bf16.msrb.mxu0 %v1253_v34  ;;  %954 = vmatpush.bf16.msrb.mxu1 %v1281_v47 }
 0x14d   :  { %941 = vmatpush.bf16.msrb.mxu0 %v1249_v45 }
 0x1b4   :  { %v633_v27 = vpop.permute.xlu0 %632 }
 0x1b5   :  { %v635_v28 = vmul.f32 %v633_v27, %v54_v26 }
 0x1b7   :  { %v636_v29 = vadd.f32 %v635_v28, %v1622_v14  ;;  %v1353_v14 = vor.u32 %v1453_v41, %v1352_v39  ;;  %v1468_v28 = vld [vmem:[%s1646_s3 + $0x9] ss:$0 sm:$0xff]  ;;  %s1560_s3 = smov [#allocation7]  }
 0x1b8   :  { %s1013_s26 = sshll.u32 %s1560_s3, 4  ;;  %s1014_s26 = int_to_ptr.vmem [resolvable:$true] %s1013_s26 }
 0x1b9   :  { %v637_v30 = vpack.c.bf16 %v636_v29, %v636_v29  ;;  %978 = vmatpush.bf16.msrb.mxu3 %v1353_v14 }
 0x1bb   :  { %1242 = vmatmul.msk.bf16.vlgmr.msra.gmra.mxu0 %vm667_vm6, %v637_v30  ;;  %1243 = vmatmul.msk.bf16.vlgmr.msra.gmra.mxu1 %vm667_vm6, %v637_v30 }
 0x1bc   :  { %1244 = vmatmul.msk.bf16.vlgmr.msra.gmra.mxu2 %vm667_vm6, %v637_v30  ;;  %1245 = vmatmul.msk.bf16.vlgmr.msra.gmra.mxu3 %vm667_vm6, %v637_v30 }
 0x1bd   :  { %979 = vmatpush.bf16.msrb.mxu3 %v1349_v53 }
 0x1c1   :  { %980 = vmatpush.bf16.msrb.mxu3 %v1345_v59 }
 0x238   :  { %v680_v63 = vpop.f32.mrf.mxu0  ;;  %v693_v0 = vpop.f32.mrf.mxu1 }
 0x239   :  { %v681_v1 = vadd.f32 %v680_v63, %v639_v61  ;;  %v694_v2 = vadd.f32 %v693_v0, %v640_v62 }
 0x23b   :  { %vm723_vm7 = vcmp.gt.f32.partialorder %v681_v1, 0.0  ;;  %v727_v3 = vmul.f32 0.01, %v681_v1  ;;  %vm724_vm8 = vcmp.gt.f32.partialorder %v694_v2, 0.0  ;;  %v728_v4 = vmul.f32 0.01, %v694_v2 }
 0x23d   :  { %v731_v7 = vsel %vm723_vm7, %v681_v1, %v727_v3  ;;  %v732_v8 = vsel %vm724_vm8, %v694_v2, %v728_v4 }
 0x23e   :  { %v735_v9 = vpack.c.bf16 %v731_v7, %v731_v7  ;;  %v736_v10 = vpack.c.bf16 %v732_v8, %v732_v8 }
 0x23f   :  { %v706_v11 = vpop.f32.mrf.mxu2  ;;  %v719_v12 = vpop.f32.mrf.mxu3 }
 0x240   :  { %v707_v13 = vadd.f32 %v706_v11, %v641_v5  ;;  %v720_v15 = vadd.f32 %v719_v12, %v642_v6  ;;  %v682_v16 = vpop.f32.mrf.mxu0  ;;  %v695_v17 = vpop.f32.mrf.mxu1  ;;  %942 = vmatmul.bf16.vlgmr.msrb.gmra.mxu0 %v735_v9  ;;  %955 = vmatmul.bf16.vlgmr.msrb.gmra.mxu1 %v736_v10 }
 0x242   :  { %vm725_vm9 = vcmp.gt.f32.partialorder %v707_v13, 0.0  ;;  %v729_v18 = vmul.f32 0.01, %v707_v13  ;;  %vm726_vm10 = vcmp.gt.f32.partialorder %v720_v15, 0.0  ;;  %v730_v19 = vmul.f32 0.01, %v720_v15 }
 0x244   :  { %v733_v20 = vsel %vm725_vm9, %v707_v13, %v729_v18  ;;  %v734_v21 = vsel %vm726_vm10, %v720_v15, %v730_v19 }
 0x245   :  { %v737_v22 = vpack.c.bf16 %v733_v20, %v733_v20  ;;  %v738_v23 = vpack.c.bf16 %v734_v21, %v734_v21 }
 0x247   :  { %v708_v24 = vpop.f32.mrf.mxu2  ;;  %v721_v25 = vpop.f32.mrf.mxu3  ;;  %968 = vmatmul.bf16.vlgmr.msrb.gmra.mxu2 %v737_v22  ;;  %981 = vmatmul.bf16.vlgmr.msrb.gmra.mxu3 %v738_v23 }
 0x2bd   :  { %v943_v26 = vpop.f32.mrf.mxu0  ;;  %v956_v27 = vpop.f32.mrf.mxu1 }
 0x2be   :  { %v944_v29 = vadd.f32 %v1468_v28, %v943_v26 }
 0x2c0   :  { %v957_v32 = vadd.f32 %v956_v27, %v944_v29 }
 0x2c5   :  { %v945_v30 = vpop.f32.mrf.mxu0  ;;  %v958_v31 = vpop.f32.mrf.mxu1 }
 0x2ca   :  { %v969_v33 = vpop.f32.mrf.mxu2  ;;  %v982_v34 = vpop.f32.mrf.mxu3 }
 0x2cb   :  { %v970_v35 = vadd.f32 %v969_v33, %v957_v32 }
 0x2cd   :  { %v983_v36 = vadd.f32 %v982_v34, %v970_v35 }
 0x2cf   :  { %v1374_v37 = vmul.f32 -1.442695, %v983_v36 }
 0x2d1   :  { %1471 = vpow2.f32 %v1374_v37 }
 0x2d2   :  { %v971_v38 = vpop.f32.mrf.mxu2  ;;  %v984_v39 = vpop.f32.mrf.mxu3 }
 0x2d7   :  { %v1472_v40 = vpop.eup %1471 }
 0x2d8   :  { %v989_v41 = vadd.f32 1.0, %v1472_v40 }
 0x2da   :  { %1473 = vrcp.f32 %v989_v41  ;;  %v1001_v44 = vand.u32 2147483648, %v989_v41  ;;  %v999_v46 = vand.u32 2147483647, %v989_v41  ;;  %vm995_vm12 = vweird.f32 %v989_v41 }
 0x2dc   :  { %v1002_v48 = vor.u32 1.1754944e-38, %v1001_v44  ;;  %vm1000_vm14 = vcmp.eq.f32.partialorder %v999_v46, 8.507059e+37 }
 0x2e0   :  { %v1474_v14 = vpop.eup %1473 }
 0x2e1   :  { %v991_v42 = vmul.f32 %v1474_v14, %v989_v41  ;;  %vm996_vm11 = vweird.f32 %v1474_v14 }
 0x2e2   :  { %vm997_vm13 = vmor %vm995_vm12, %vm996_vm11 }
 0x2e3   :  { %v992_v43 = vsub.f32 1.0, %v991_v42 }
 0x2e5   :  { %v993_v45 = vmul.f32 %v1474_v14, %v992_v43 }
 0x2e7   :  { %v994_v47 = vadd.f32 %v1474_v14, %v993_v45 }
 0x2e9   :  { %v998_v49 = vsel %vm997_vm13, %v1474_v14, %v994_v47 }
 0x2ea   :  { %v1003_v50 = vsel %vm1000_vm14, %v1002_v48, %v998_v49 }
 0x2eb   :  { %1005 = vst.msk [vmem:[#allocation7] sm:$0xff] %vm301_vm0, %v1003_v50 }
 0x2ec   :  { %1018 = dma.vmem_to_hbm [thread:$0]  %s1014_s26, 128, %s1016_s29, [#allocation4]  }
 0x2ed   :  { %1551 = dma.done.wait [#allocation4], 128  }
 0x2ee   :  { %1552 = vsyncadd [#allocation4], 4294967168 }
 0x2ef   :  { %1027 = vsyncpa [#allocation3], 1 }
 0x2f0   :  { %1028 = vsyncpa [#allocation6], 1 }
 0x2f1   :  { %1029 = vsyncpa [#allocation4], 1 }

</bundles_post_ra>
